<compile_context>
chip_gen: v6e
topology: v6e:2x2x1
jax: 0.10.0
libtpu: 0.0.40
codegen_flags: <defaults>
</compile_context>

<pallas_src>
import jax
import jax.numpy as jnp
from jax.experimental import pallas as pl
from jax.experimental.pallas import tpu as pltpu


def _pair(v):
    return (v, v) if isinstance(v, int) else tuple(v)


def _round_up(x, m):
    return ((x + m - 1) // m) * m


_VMEM_BUDGET = 40 * 1024 * 1024   # conservative; leaves headroom under v7x's 64 MiB


# --------------------------------------------------------------------------
# Kernels
# --------------------------------------------------------------------------
def _matmul_bias_kernel(x_ref, w_ref, b_ref, o_ref):
    """Full-K path: one MXU pass per (i, j) tile; weights stay VMEM-resident."""
    o_ref[...] = (
        jnp.dot(x_ref[...], w_ref[...], preferred_element_type=jnp.float32)
        + b_ref[...]
    ).astype(o_ref.dtype)


def _matmul_bias_ksplit_kernel(x_ref, w_ref, b_ref, o_ref):
    """K-split fallback: accumulate directly into the resident f32 output tile."""
    kk = pl.program_id(2)

    @pl.when(kk == 0)
    def _():
        o_ref[...] = jnp.broadcast_to(b_ref[...], o_ref.shape).astype(o_ref.dtype)

    o_ref[...] += jnp.dot(x_ref[...], w_ref[...],
                          preferred_element_type=jnp.float32)


# --------------------------------------------------------------------------
# Tiling selection (generation-agnostic, VMEM-budgeted)
# --------------------------------------------------------------------------
def _select_tiling(m, k, cout, itemsize):
    sub = 8 * (4 // itemsize)                 # sublane multiple: f32->8, bf16->16
    k_pad = _round_up(k, sub)

    # N tile: single j step whenever Cout is modest, so the (big) patches
    # operand is streamed from HBM exactly once.
    if cout <= 512:
        tile_n = _round_up(cout, 128)
    else:
        tile_n = 256
    cout_pad = _round_up(cout, tile_n)

    def fits(tm, tk):
        x_b = 2 * tm * tk * itemsize          # double-buffered patches tile
        w_b = 2 * tk * tile_n * itemsize      # weight tile (budget 2 bufs)
        o_b = 2 * tm * tile_n * 4             # f32 output tile
        b_b = 2 * tile_n * 4
        return x_b + w_b + o_b + b_b <= _VMEM_BUDGET

    # M tile: big, but keep >=2 M blocks so v7x megacore gets both cores busy.
    tile_m = 512
    while tile_m > 128 and _round_up(m, tile_m) // tile_m < 2:
        tile_m //= 2

    # Prefer the full-K (resident weight, no accumulator) path.
    tile_k = k_pad
    while tile_m > 128 and not fits(tile_m, tile_k):
        tile_m //= 2

    ksplit = not fits(tile_m, tile_k)
    if ksplit:
        tile_k = 512
        k_pad = _round_up(k, tile_k)
        while tile_m > 128 and not fits(tile_m, tile_k):
            tile_m //= 2

    m_pad = _round_up(m, tile_m)
    return tile_m, tile_n, tile_k, m_pad, k_pad, cout_pad, ksplit


# --------------------------------------------------------------------------
# Wrapper: im2col (XLA) + lane-dense Pallas matmul.
# --------------------------------------------------------------------------
def quantized_conv2d(x_nchw, weight_oihw, bias, stride=1, padding=0, dilation=1,
                     groups=1, *, compute_dtype=jnp.float32, nhwc_output=False):
    """Forward pass of QuantizedConv2d (which is just F.conv2d) via Pallas.

    compute_dtype=float32 matches F.conv2d semantics; bfloat16 is the fast MXU
    operand path on v6e/v7x (accumulation stays f32 either way).
    """
    # TODO(synk): groups != 1 (grouped / depthwise conv) not implemented.
    assert groups == 1
    # TODO(synk): the PyTorch module performs no real int8 quantization, so the
    # int8-operand + per-channel-scale path (v5e/v6e native int MXU) is not
    # implemented; on v7x (no int MXU) bf16/fp8 would be the fast path anyway.

    sh, sw = _pair(stride)
    ph, pw = _pair(padding)
    dh, dw = _pair(dilation)

    n, cin, h, w = x_nchw.shape
    cout, cin_w, kh, kw = weight_oihw.shape
    assert cin_w == cin

    oh = (h + 2 * ph - dh * (kh - 1) - 1) // sh + 1
    ow = (w + 2 * pw - dw * (kw - 1) - 1) // sw + 1

    itemsize = jnp.dtype(compute_dtype).itemsize

    # --- im2col in the wrapper, materialized directly in compute_dtype -------
    x_nhwc = jnp.transpose(x_nchw, (0, 2, 3, 1)).astype(compute_dtype)
    x_padded = jnp.pad(x_nhwc, ((0, 0), (ph, ph), (pw, pw), (0, 0)))
    cols = []
    for i in range(kh):
        for j in range(kw):
            h0, w0 = i * dh, j * dw
            patch = jax.lax.slice(
                x_padded,
                (0, h0, w0, 0),
                (n, h0 + (oh - 1) * sh + 1, w0 + (ow - 1) * sw + 1, cin),
                (1, sh, sw, 1),
            )                                   # (N, OH, OW, Cin)
            cols.append(patch)
    # K ordering is (kh, kw, cin), matching the HWIO weight reshape below.
    patches = jnp.concatenate(cols, axis=-1).reshape(n * oh * ow, kh * kw * cin)
    # TODO(synk): fusing im2col into the kernel (per-tap BlockSpecs or manual
    # DMA) would remove the ~kh*kw x HBM amplification of this materialization.

    # Weight OIHW -> HWIO -> (KH*KW*Cin, Cout) matrix.
    w_mat = jnp.transpose(weight_oihw, (2, 3, 1, 0)).astype(compute_dtype)
    w_mat = w_mat.reshape(kh * kw * cin, cout)

    if bias is None:
        bias = jnp.zeros((cout,), jnp.float32)
    bias = bias.astype(jnp.float32)

    m = n * oh * ow
    k = kh * kw * cin
    tile_m, tile_n, tile_k, m_pad, k_pad, cout_pad, ksplit = _select_tiling(
        m, k, cout, itemsize)

    # --- pad to tile-aligned shapes (K only to the sublane multiple) ---------
    patches = jnp.pad(patches, ((0, m_pad - m), (0, k_pad - k)))
    w_mat = jnp.pad(w_mat, ((0, k_pad - k), (0, cout_pad - cout)))
    b2d = jnp.pad(bias, (0, cout_pad - cout)).reshape(1, cout_pad)

    flops = 2 * m_pad * k_pad * cout_pad
    bytes_accessed = (m_pad * k_pad * itemsize + k_pad * cout_pad * itemsize
                      + m_pad * cout_pad * 4 + cout_pad * 4)
    fp = (2 * tile_m * tile_k * itemsize + 2 * tile_k * tile_n * itemsize
          + 2 * tile_m * tile_n * 4 + 2 * tile_n * 4)
    vmem_limit = min(64 << 20, max(32 << 20, int(fp * 3 // 2)))

    if not ksplit:
        grid = (m_pad // tile_m, cout_pad // tile_n)
        kernel = _matmul_bias_kernel
        in_specs = [
            pl.BlockSpec((tile_m, k_pad), lambda i, j: (i, 0)),
            pl.BlockSpec((k_pad, tile_n), lambda i, j: (0, j)),  # VMEM-resident
            pl.BlockSpec((1, tile_n), lambda i, j: (0, j)),
        ]
        out_specs = pl.BlockSpec((tile_m, tile_n), lambda i, j: (i, j))
        dim_sem = ("parallel", "parallel")
    else:
        grid = (m_pad // tile_m, cout_pad // tile_n, k_pad // tile_k)
        kernel = _matmul_bias_ksplit_kernel
        in_specs = [
            pl.BlockSpec((tile_m, tile_k), lambda i, j, kk: (i, kk)),
            pl.BlockSpec((tile_k, tile_n), lambda i, j, kk: (kk, j)),
            pl.BlockSpec((1, tile_n), lambda i, j, kk: (0, j)),
        ]
        out_specs = pl.BlockSpec((tile_m, tile_n), lambda i, j, kk: (i, j))
        dim_sem = ("parallel", "parallel", "arbitrary")

    out_flat = pl.pallas_call(
        kernel,
        out_shape=jax.ShapeDtypeStruct((m_pad, cout_pad), jnp.float32),
        grid_spec=pltpu.PrefetchScalarGridSpec(
            num_scalar_prefetch=0,
            grid=grid,
            in_specs=in_specs,
            out_specs=out_specs,
        ),
        compiler_params=pltpu.CompilerParams(
            dimension_semantics=dim_sem,
            vmem_limit_bytes=vmem_limit),
        cost_estimate=pl.CostEstimate(
            flops=flops, transcendentals=0, bytes_accessed=bytes_accessed),
    )(patches, w_mat, b2d)

    # Strip padding; restore layout.
    out = out_flat[:m, :cout].reshape(n, oh, ow, cout)
    if nhwc_output:
        return out
    # TODO(synk): this NCHW transpose re-streams the whole output through HBM;
    # pass nhwc_output=True when the consumer accepts NHWC.
    return jnp.transpose(out, (0, 3, 1, 2))


# --------------------------------------------------------------------------
# Reference (pure XLA) implementation for checking.
# --------------------------------------------------------------------------
def _reference_conv2d(x_nchw, weight_oihw, bias, stride, padding, dilation):
    stride = _pair(stride)
    padding = _pair(padding)
    dilation = _pair(dilation)
    out = jax.lax.conv_general_dilated(
        x_nchw.astype(jnp.float32),
        weight_oihw.astype(jnp.float32),
        window_strides=stride,
        padding=[(padding[0], padding[0]), (padding[1], padding[1])],
        rhs_dilation=dilation,
        dimension_numbers=("NCHW", "OIHW", "NCHW"),
    )
    if bias is not None:
        out = out + bias.astype(jnp.float32)[None, :, None, None]
    return out


def _make_inputs(key, n, cin, h, w, cout, k):
    kx, kw_, kb = jax.random.split(key, 3)
    x = jax.random.normal(kx, (n, cin, h, w), dtype=jnp.float32)
    fan_in = cin * k * k
    bound = 1.0 / (fan_in ** 0.5)
    weight = jax.random.uniform(kw_, (cout, cin, k, k), jnp.float32,
                                minval=-bound, maxval=bound)
    bias = jax.random.uniform(kb, (cout,), jnp.float32,
                              minval=-bound, maxval=bound)
    return x, weight, bias


if __name__ == "__main__":
    key = jax.random.PRNGKey(0)
    k1, k2 = jax.random.split(key)

    # --- Test 1: QuantizedConv2d(4, 8, 3, stride=1, padding=1), f32 path -----
    N, C_IN, H, W = 2, 4, 16, 16
    C_OUT, K = 8, 3
    x, weight, bias = _make_inputs(k1, N, C_IN, H, W, C_OUT, K)

    ref = _reference_conv2d(x, weight, bias, 1, 1, 1)
    out_f32 = quantized_conv2d(x, weight, bias, stride=1, padding=1, dilation=1,
                               groups=1, compute_dtype=jnp.float32)
    out_f32 = jax.block_until_ready(out_f32)
    assert out_f32.shape == ref.shape == (N, C_OUT, H, W)
    assert jnp.allclose(out_f32, ref, atol=1e-4, rtol=1e-4)

    # --- Test 2: same shape, bf16 MXU operands (v6e/v7x fast path) ----------
    out_bf16 = quantized_conv2d(x, weight, bias, stride=1, padding=1, dilation=1,
                                groups=1, compute_dtype=jnp.bfloat16)
    out_bf16 = jax.block_until_ready(out_bf16)
    assert out_bf16.shape == ref.shape
    assert jnp.allclose(out_bf16, ref, atol=2e-2, rtol=2e-2)

    # --- Test 3: larger strided conv (2 M blocks, K=288), f32 path ----------
    N2, C_IN2, H2, W2 = 2, 32, 28, 28
    C_OUT2, K2 = 64, 3
    x2, weight2, bias2 = _make_inputs(k2, N2, C_IN2, H2, W2, C_OUT2, K2)

    ref2 = _reference_conv2d(x2, weight2, bias2, 2, 1, 1)
    out2 = quantized_conv2d(x2, weight2, bias2, stride=2, padding=1, dilation=1,
                            groups=1, compute_dtype=jnp.float32)
    out2 = jax.block_until_ready(out2)
    assert out2.shape == ref2.shape == (N2, C_OUT2, 14, 14)
    assert jnp.allclose(out2, ref2, atol=5e-3, rtol=5e-3)

    print("KERNEL_OK")
</pallas_src>

<mosaic_0001>
module attributes {stable_mosaic.version = 11 : i64} {
  func.func @_matmul_bias_kernel(%arg0: i32, %arg1: i32, %arg2: memref<256x40xf32, #tpu.memory_space<vmem>>, %arg3: memref<40x128xf32, #tpu.memory_space<vmem>>, %arg4: memref<1x128xf32, #tpu.memory_space<vmem>>, %arg5: memref<256x128xf32, #tpu.memory_space<vmem>>) attributes {dimension_semantics = [#tpu.dimension_semantics<parallel>, #tpu.dimension_semantics<parallel>], iteration_bounds = array<i64: 2, 1>, scalar_prefetch = 0 : i64, scratch_operands = 0 : i64, tpu.core_type = #tpu.core_type<tc>, window_params = [{transform_indices = @transform_0, window_bounds = array<i64: 256, 40>}, {transform_indices = @transform_1, window_bounds = array<i64: 40, 128>}, {transform_indices = @transform_2, window_bounds = array<i64: 1, 128>}, {transform_indices = @transform_3, window_bounds = array<i64: 256, 128>}]} {
    %c0 = arith.constant 0 : index
    %c0_0 = arith.constant 0 : index
    %0 = vector.load %arg2[%c0, %c0_0] : memref<256x40xf32, #tpu.memory_space<vmem>>, vector<256x40xf32>
    %c0_1 = arith.constant 0 : index
    %c0_2 = arith.constant 0 : index
    %1 = vector.load %arg3[%c0_1, %c0_2] : memref<40x128xf32, #tpu.memory_space<vmem>>, vector<40x128xf32>
    %cst = arith.constant dense<0.000000e+00> : vector<256x128xf32>
    %2 = tpu.matmul %0, %1, %cst {dimension_numbers = #tpu.dot_dimension_numbers<[1], [0], [0], [1], [0, 0, 1, 1], [], []>} : vector<256x40xf32>, vector<40x128xf32>, vector<256x128xf32> -> vector<256x128xf32>
    %c0_3 = arith.constant 0 : index
    %c0_4 = arith.constant 0 : index
    %3 = vector.load %arg4[%c0_3, %c0_4] : memref<1x128xf32, #tpu.memory_space<vmem>>, vector<1x128xf32>
    %4 = vector.broadcast %3 : vector<1x128xf32> to vector<256x128xf32>
    %5 = arith.addf %2, %4 : vector<256x128xf32>
    %c0_5 = arith.constant 0 : index
    %c0_6 = arith.constant 0 : index
    %6 = vector.load %arg5[%c0_5, %c0_6] : memref<256x128xf32, #tpu.memory_space<vmem>>, vector<256x128xf32>
    tpu.vector_store %arg5[%c0_5, %c0_6], %5 {strides = array<i32>} : memref<256x128xf32, #tpu.memory_space<vmem>>, vector<256x128xf32>,
    return
  }
  func.func @transform_0(%arg0: i32, %arg1: i32) -> (i32, i32) {
    %c0_i32 = arith.constant 0 : i32
    %c0_i32_0 = arith.constant 0 : i32
    return %arg0, %c0_i32 : i32, i32
  }
  func.func @transform_1(%arg0: i32, %arg1: i32) -> (i32, i32) {
    %c0_i32 = arith.constant 0 : i32
    %c0_i32_0 = arith.constant 0 : i32
    return %c0_i32, %arg1 : i32, i32
  }
  func.func @transform_2(%arg0: i32, %arg1: i32) -> (i32, i32) {
    %c0_i32 = arith.constant 0 : i32
    %c0_i32_0 = arith.constant 0 : i32
    return %c0_i32, %arg1 : i32, i32
  }
  func.func @transform_3(%arg0: i32, %arg1: i32) -> (i32, i32) {
    %c0_i32 = arith.constant 0 : i32
    return %arg0, %arg1 : i32, i32
  }
}

</mosaic_0001>

<bundles_post_ra>
// kernel: tpu_custom_call.1
= control target key start
LH: loop header
LB: loop body
LE: loop exit
PB: predicated region body
PF: predicated region fallthrough
CT: control target
= control target key end

     0   :  { %8 = vsyncpa [#allocation3], 0  ;;  %s1311_s0 = inlined_call_operand.vmem [shape: f32[512,40], index: 0, kind: input, shape index: {}]   ;;  %s1312_s1 = inlined_call_operand.vmem [shape: f32[40,128], index: 1, kind: input, shape index: {}]   ;;  %s1313_s2 = inlined_call_operand.vmem [shape: f32[1,128], index: 2, kind: input, shape index: {}]   ;;  %s1314_s3 = inlined_call_operand.hbm [shape: f32[512,128], index: 3, kind: output, shape index: {}]  }
   0x1   :  { %10 = vsyncpa [#allocation3 + $0x1], 0  ;;  %s1041_s12 = smov 0   ;;  %s1043_s13 = smov 0  }
   0x2   :  { %s1045_s14 = smov 0   ;;  %s1047_s15 = smov 0  }
   0x3   :  { %s1049_s16 = smov 0   ;;  %s1051_s17 = smov 0  }
   0x4 LB: > { %s729_s18 = sadd.s32 4294967295, %s1016_s17   ;;  %s730_s19 = sadd.s32 4294967294, %s1016_s17   ;;  %s1016_s17 = sphi %s1051_s17, %s16_s17   ;;  %s1012_s16 = sphi %s1049_s16, %s1321_s16   ;;  %s1008_s15 = sphi %s1047_s15, %s1320_s15   ;;  %s1004_s14 = sphi %s1045_s14, %s1319_s14   ;;  %s1000_s13 = sphi %s1043_s13, %s1318_s13   ;;  %s996_s12 = sphi %s1041_s12, %s1317_s12  }
   0x5   : > { %s28_s20 = sadd.s32 1, %s1012_s16  ;;  %s115_s21 = sadd.s32 1, %s1004_s14 }
   0x6   : > { %p30_p0 = scmp.ge.s32.totalorder %s28_s20, 2  ;;  %p125_p1 = scmp.ne.s32.totalorder %s1004_s14, %s1000_s13 }
   0x7   : > { %p126_p2 = scmp.eq.s32.totalorder %s729_s18, 1  ;;  %p131_p3 = scmp.ne.s32.totalorder %s1000_s13, %s996_s12 }
   0x8   : > { %s1323_s20 = smov (%p30_p0, %s28_s20), 0  ;;  %p132_p5 = scmp.eq.s32.totalorder %s730_s19, 1 }
   0x9   : > { %p1081_p4 = por %p126_p2, %p125_p1  ;;  %s110_s23 = ssub.s32 %s1012_s16, %s1323_s20 }
   0xa   : > { %p735_p6 = scmp.ge.s32.totalorder %s1016_s17, 1  ;;  %p113_p7 = scmp.eq.s32.totalorder %s110_s23, 0 }
   0xb   : > { %p1088_p8 = por %p132_p5, %p131_p3  ;;  %p172_p9 = scmp.lt.s32.totalorder %s1016_s17, 3 }
   0xc   : > { %s1094_s25 = scalar_select %p113_p7, %s1004_s14, %s115_s21  }
   0xd   : > { %p173_p10 = pnand %p735_p6, %p172_p9 }
   0xe   : > { %s737_s30 = sshll.u32 (!%p173_p10), %s1008_s15, 5  ;;  %s200_s21 = sand.u32 (!%p173_p10), 1, %s1000_s13  }
   0xf   : > { %176 = sbr.rel (%p173_p10) target bundleno = 271 (0x10f), region = 32  ;;  %p204_p11 = scmp.lt.s32.totalorder (!%p173_p10), %s737_s30, 63 }
  0x10   : > { %s736_s23 = sshll.u32 (!%p173_p10), %s200_s21, 8  ;;  %s777_s29 = sshll.u32 (!%p173_p10), %s1008_s15, 12 }
  0x11   : > { %s1191_s28 = scalar_lea.vmem (!%p173_p10), [#allocation2], %s736_s23  ;;  %s1254_s6 = scalar_lea.hbm (!%p173_p10), %s1314_s3, %s777_s29 }
  0x12   : > { %s1266_s15 = scalar_lea.sflag (!%p173_p10), [#allocation3], %s200_s21 }
  0x14   : > { %v253_v0 = vld [vmem:[%s1312_s1 + $0x20] sm:$0xff]  ;;  %v252_v1 = vld [vmem:[%s1312_s1 + $0x18] sm:$0xff]  ;;  %v251_v2 = vld [vmem:[%s1312_s1 + $0x10] sm:$0xff]  ;;  %s1325_s30 = smov (!%p204_p11, %s737_s30), 63  ;;  %vm261_vm0 = vcmask 326656  }
  0x15   : > { %815 = vmatprep.subr.mxu0 %v253_v0  ;;  %873 = vmatprep.subr.mxu1 %v253_v0  ;;  %v250_v3 = vld [vmem:[%s1312_s1 + $0x8] sm:$0xff]  ;;  %s738_s8 = sshll.u32 %s1325_s30, 3  ;;  %v249_v4 = vld [vmem:[%s1312_s1] sm:$0xff]  ;;  %s630_s30 = sshll.u32 %s1191_s28, 4  ;;  %s1256_s30 = int_to_ptr.vmem [resolvable:$true] %s630_s30 }
  0x16   : > { %816 = vmatpush3.msra.mxu0 %v253_v0  ;;  %878 = vmatpush3.msra.mxu1 %v253_v0  ;;  %s1115_s19 = scalar_lea.vmem %s1311_s0, %s738_s8  ;;  %v1187_v37 = vld [vmem:[%s1313_s2] ss:$0 sm:$0xff]  ;;  %s940_s7 = scalar_lea.vmem %s1256_s30, 4096 }
  0x17   : > { %817 = vmatprep.subr.mxu0 %v252_v1  ;;  %874 = vmatprep.subr.mxu1 %v252_v1  ;;  %v217_v5 = vld [vmem:[%s1115_s19] sm:$0xff]  ;;  %v218_v7 = vld [vmem:[%s1115_s19 + $0x8] sm:$0xff]  ;;  %v219_v9 = vld [vmem:[%s1115_s19 + $0x10] sm:$0xff]  ;;  %p941_p12 = scmp.ne.s32.totalorder %s1256_s30, %s940_s7  ;;  %s1018_s8 = smov [#allocation2]  }
  0x18   : > { %818 = vmatpush3.msra.mxu0 %v252_v1  ;;  %879 = vmatpush3.msra.mxu1 %v252_v1  ;;  %v233_v6 = vld [vmem:[%s1115_s19 + $0x80] sm:$0xff]  ;;  %v234_v8 = vld [vmem:[%s1115_s19 + $0x88] sm:$0xff]  ;;  %v235_v10 = vld [vmem:[%s1115_s19 + $0x90] sm:$0xff]  ;;  %s944_s9 = sshll.u32 %s1018_s8, 4  ;;  %s945_s9 = int_to_ptr.vmem [resolvable:$false] %s944_s9 }
  0x19   : > { %819 = vmatprep.subr.mxu0 %v251_v2  ;;  %875 = vmatprep.subr.mxu1 %v251_v2  ;;  %v220_v11 = vld [vmem:[%s1115_s19 + $0x18] sm:$0xff]  ;;  %v221_v13 = vld [vmem:[%s1115_s19 + $0x20] sm:$0xff]  ;;  %v222_v15 = vld [vmem:[%s1115_s19 + $0x28] sm:$0xff]  ;;  %p942_p13 = pnand %p941_p12, %p1081_p4  ;;  %s946_s10 = scalar_lea.vmem %s945_s9, 8192 }
  0x1a   : > { %820 = vmatpush3.msra.mxu0 %v251_v2  ;;  %880 = vmatpush3.msra.mxu1 %v251_v2  ;;  %v236_v12 = vld [vmem:[%s1115_s19 + $0x98] sm:$0xff]  ;;  %v237_v14 = vld [vmem:[%s1115_s19 + $0xa0] sm:$0xff]  ;;  %v238_v16 = vld [vmem:[%s1115_s19 + $0xa8] sm:$0xff]  ;;  %p947_p1 = scmp.lt.s32.totalorder %s1256_s30, %s945_s9  ;;  %p948_p2 = scmp.lt.s32.totalorder %s946_s10, %s940_s7 }
  0x1b   : > { %821 = vmatprep.subr.mxu0 %v250_v3  ;;  %876 = vmatprep.subr.mxu1 %v250_v3  ;;  %v223_v17 = vld [vmem:[%s1115_s19 + $0x30] sm:$0xff]  ;;  %v224_v19 = vld [vmem:[%s1115_s19 + $0x38] sm:$0xff]  ;;  %v225_v21 = vld [vmem:[%s1115_s19 + $0x40] sm:$0xff]  ;;  %p943_p0 = pneg %p942_p13 }
  0x1c   : > { %822 = vmatpush3.msra.mxu0 %v250_v3  ;;  %881 = vmatpush3.msra.mxu1 %v250_v3  ;;  %v239_v18 = vld [vmem:[%s1115_s19 + $0xb0] sm:$0xff]  ;;  %v240_v20 = vld [vmem:[%s1115_s19 + $0xb8] sm:$0xff]  ;;  %v241_v22 = vld [vmem:[%s1115_s19 + $0xc0] sm:$0xff]  ;;  %p949_p3 = por %p948_p2, %p947_p1 }
  0x1d   : > { %823 = vmatprep.subr.mxu0 %v249_v4  ;;  %877 = vmatprep.subr.mxu1 %v249_v4  ;;  %v226_v23 = vld [vmem:[%s1115_s19 + $0x48] sm:$0xff]  ;;  %v227_v25 = vld [vmem:[%s1115_s19 + $0x50] sm:$0xff]  ;;  %v228_v27 = vld [vmem:[%s1115_s19 + $0x58] sm:$0xff] }
  0x1e   : > { %824 = vmatpush3.msra.mxu0 %v249_v4  ;;  %882 = vmatpush3.msra.mxu1 %v249_v4  ;;  %v242_v24 = vld [vmem:[%s1115_s19 + $0xc8] sm:$0xff]  ;;  %v243_v26 = vld [vmem:[%s1115_s19 + $0xd0] sm:$0xff]  ;;  %v244_v28 = vld [vmem:[%s1115_s19 + $0xd8] sm:$0xff]  ;;  %p950_p5 = pnand %p949_p3, %p943_p0 }
  0x1f   : > { %825 = vmatprep.mubr.msk.f32.mxu0 %vm261_vm0, %v217_v5  ;;  %849 = vmatprep.mubr.msk.f32.mxu1 %vm261_vm0, %v233_v6  ;;  %v229_v29 = vld [vmem:[%s1115_s19 + $0x60] sm:$0xff]  ;;  %v230_v31 = vld [vmem:[%s1115_s19 + $0x68] sm:$0xff]  ;;  %v231_v33 = vld [vmem:[%s1115_s19 + $0x70] sm:$0xff] }
  0x20   : > { %826 = vmatmul.mubr.msk.f32.vlgmr.msra.gmra.mxu0 %vm261_vm0, %v218_v7  ;;  %850 = vmatmul.mubr.msk.f32.vlgmr.msra.gmra.mxu1 %vm261_vm0, %v234_v8  ;;  %v245_v30 = vld [vmem:[%s1115_s19 + $0xe0] sm:$0xff]  ;;  %v246_v32 = vld [vmem:[%s1115_s19 + $0xe8] sm:$0xff]  ;;  %v247_v34 = vld [vmem:[%s1115_s19 + $0xf0] sm:$0xff] }
  0x21   : > { %828 = vmatprep.mubr.msk.f32.mxu0 %vm261_vm0, %v219_v9  ;;  %852 = vmatprep.mubr.msk.f32.mxu1 %vm261_vm0, %v235_v10  ;;  %v232_v35 = vld [vmem:[%s1115_s19 + $0x78] sm:$0xff] }
  0x22   : > { %v248_v36 = vld [vmem:[%s1115_s19 + $0xf8] sm:$0xff] }
  0x24   : > { %829 = vmatmul.mubr.msk.f32.gmra.mxu0 %vm261_vm0, %v220_v11  ;;  %853 = vmatmul.mubr.msk.f32.gmra.mxu1 %vm261_vm0, %v236_v12 }
  0x25   : > { %831 = vmatprep.mubr.msk.f32.mxu0 %vm261_vm0, %v221_v13  ;;  %855 = vmatprep.mubr.msk.f32.mxu1 %vm261_vm0, %v237_v14 }
  0x28   : > { %832 = vmatmul.mubr.msk.f32.gmra.mxu0 %vm261_vm0, %v222_v15  ;;  %856 = vmatmul.mubr.msk.f32.gmra.mxu1 %vm261_vm0, %v238_v16 }
  0x29   : > { %834 = vmatprep.mubr.msk.f32.mxu0 %vm261_vm0, %v223_v17  ;;  %858 = vmatprep.mubr.msk.f32.mxu1 %vm261_vm0, %v239_v18 }
  0x2c   : > { %835 = vmatmul.mubr.msk.f32.gmra.mxu0 %vm261_vm0, %v224_v19  ;;  %859 = vmatmul.mubr.msk.f32.gmra.mxu1 %vm261_vm0, %v240_v20 }
  0x2d   : > { %837 = vmatprep.mubr.msk.f32.mxu0 %vm261_vm0, %v225_v21  ;;  %861 = vmatprep.mubr.msk.f32.mxu1 %vm261_vm0, %v241_v22 }
  0x30   : > { %838 = vmatmul.mubr.msk.f32.gmra.mxu0 %vm261_vm0, %v226_v23  ;;  %862 = vmatmul.mubr.msk.f32.gmra.mxu1 %vm261_vm0, %v242_v24 }
  0x31   : > { %840 = vmatprep.mubr.msk.f32.mxu0 %vm261_vm0, %v227_v25  ;;  %864 = vmatprep.mubr.msk.f32.mxu1 %vm261_vm0, %v243_v26 }
  0x34   : > { %841 = vmatmul.mubr.msk.f32.gmra.mxu0 %vm261_vm0, %v228_v27  ;;  %865 = vmatmul.mubr.msk.f32.gmra.mxu1 %vm261_vm0, %v244_v28 }
  0x35   : > { %843 = vmatprep.mubr.msk.f32.mxu0 %vm261_vm0, %v229_v29  ;;  %867 = vmatprep.mubr.msk.f32.mxu1 %vm261_vm0, %v245_v30 }
  0x38   : > { %844 = vmatmul.mubr.msk.f32.gmra.mxu0 %vm261_vm0, %v230_v31  ;;  %868 = vmatmul.mubr.msk.f32.gmra.mxu1 %vm261_vm0, %v246_v32 }
  0x39   : > { %846 = vmatprep.mubr.msk.f32.mxu0 %vm261_vm0, %v231_v33  ;;  %870 = vmatprep.mubr.msk.f32.mxu1 %vm261_vm0, %v247_v34 }
  0x3c   : > { %847 = vmatmul.mubr.msk.f32.gmra.mxu0 %vm261_vm0, %v232_v35  ;;  %871 = vmatmul.mubr.msk.f32.gmra.mxu1 %vm261_vm0, %v248_v36 }
  0xe0   : > { %v827_v38 = vpop.f32.mrf.mxu0  ;;  %v851_v39 = vpop.f32.mrf.mxu1 }
  0xe1   : > { %v430_v40 = vadd.f32 %v827_v38, %v1187_v37  ;;  %v510_v41 = vadd.f32 %v851_v39, %v1187_v37 }
  0xe2   : > { %v424_v42 = vpop.f32.mrf.mxu0  ;;  %v504_v43 = vpop.f32.mrf.mxu1 }
  0xe3   : > { %584 = vst [vmem:[%s1191_s28 + $0x8] sm:$0xff] %v430_v40  ;;  %600 = vst [vmem:[%s1191_s28 + $0x88] sm:$0xff] %v510_v41  ;;  %v425_v44 = vadd.f32 %v1187_v37, %v424_v42  ;;  %v505_v45 = vadd.f32 %v1187_v37, %v504_v43 }
  0xe4   : > { %v830_v46 = vpop.f32.mrf.mxu0  ;;  %v854_v47 = vpop.f32.mrf.mxu1 }
  0xe5   : > { %583 = vst [vmem:[%s1191_s28] sm:$0xff] %v425_v44  ;;  %599 = vst [vmem:[%s1191_s28 + $0x80] sm:$0xff] %v505_v45  ;;  %v440_v48 = vadd.f32 %v830_v46, %v1187_v37  ;;  %v520_v49 = vadd.f32 %v854_v47, %v1187_v37 }
  0xe6   : > { %v434_v50 = vpop.f32.mrf.mxu0  ;;  %v514_v51 = vpop.f32.mrf.mxu1 }
  0xe7   : > { %586 = vst [vmem:[%s1191_s28 + $0x18] sm:$0xff] %v440_v48  ;;  %602 = vst [vmem:[%s1191_s28 + $0x98] sm:$0xff] %v520_v49  ;;  %v435_v52 = vadd.f32 %v1187_v37, %v434_v50  ;;  %v515_v53 = vadd.f32 %v1187_v37, %v514_v51 }
  0xe8   : > { %v833_v54 = vpop.f32.mrf.mxu0  ;;  %v857_v55 = vpop.f32.mrf.mxu1 }
  0xe9   : > { %585 = vst [vmem:[%s1191_s28 + $0x10] sm:$0xff] %v435_v52  ;;  %601 = vst [vmem:[%s1191_s28 + $0x90] sm:$0xff] %v515_v53  ;;  %v450_v56 = vadd.f32 %v833_v54, %v1187_v37  ;;  %v530_v57 = vadd.f32 %v857_v55, %v1187_v37 }
  0xea   : > { %v444_v58 = vpop.f32.mrf.mxu0  ;;  %v524_v59 = vpop.f32.mrf.mxu1 }
  0xeb   : > { %588 = vst [vmem:[%s1191_s28 + $0x28] sm:$0xff] %v450_v56  ;;  %604 = vst [vmem:[%s1191_s28 + $0xa8] sm:$0xff] %v530_v57  ;;  %v445_v60 = vadd.f32 %v1187_v37, %v444_v58  ;;  %v525_v61 = vadd.f32 %v1187_v37, %v524_v59 }
  0xec   : > { %v836_v62 = vpop.f32.mrf.mxu0  ;;  %v860_v63 = vpop.f32.mrf.mxu1 }
  0xed   : > { %587 = vst [vmem:[%s1191_s28 + $0x20] sm:$0xff] %v445_v60  ;;  %603 = vst [vmem:[%s1191_s28 + $0xa0] sm:$0xff] %v525_v61  ;;  %v460_v0 = vadd.f32 %v836_v62, %v1187_v37  ;;  %v540_v1 = vadd.f32 %v860_v63, %v1187_v37 }
  0xee   : > { %v454_v2 = vpop.f32.mrf.mxu0  ;;  %v534_v3 = vpop.f32.mrf.mxu1 }
  0xef   : > { %590 = vst [vmem:[%s1191_s28 + $0x38] sm:$0xff] %v460_v0  ;;  %606 = vst [vmem:[%s1191_s28 + $0xb8] sm:$0xff] %v540_v1  ;;  %v455_v4 = vadd.f32 %v1187_v37, %v454_v2  ;;  %v535_v5 = vadd.f32 %v1187_v37, %v534_v3 }
  0xf0   : > { %v839_v6 = vpop.f32.mrf.mxu0  ;;  %v863_v7 = vpop.f32.mrf.mxu1 }
  0xf1   : > { %589 = vst [vmem:[%s1191_s28 + $0x30] sm:$0xff] %v455_v4  ;;  %605 = vst [vmem:[%s1191_s28 + $0xb0] sm:$0xff] %v535_v5  ;;  %v470_v8 = vadd.f32 %v839_v6, %v1187_v37  ;;  %v550_v9 = vadd.f32 %v863_v7, %v1187_v37 }
  0xf2   : > { %v464_v10 = vpop.f32.mrf.mxu0  ;;  %v544_v11 = vpop.f32.mrf.mxu1 }
  0xf3   : > { %592 = vst [vmem:[%s1191_s28 + $0x48] sm:$0xff] %v470_v8  ;;  %608 = vst [vmem:[%s1191_s28 + $0xc8] sm:$0xff] %v550_v9  ;;  %v465_v12 = vadd.f32 %v1187_v37, %v464_v10  ;;  %v545_v13 = vadd.f32 %v1187_v37, %v544_v11 }
  0xf4   : > { %v842_v14 = vpop.f32.mrf.mxu0  ;;  %v866_v15 = vpop.f32.mrf.mxu1 }
  0xf5   : > { %591 = vst [vmem:[%s1191_s28 + $0x40] sm:$0xff] %v465_v12  ;;  %607 = vst [vmem:[%s1191_s28 + $0xc0] sm:$0xff] %v545_v13  ;;  %v480_v16 = vadd.f32 %v842_v14, %v1187_v37  ;;  %v560_v17 = vadd.f32 %v866_v15, %v1187_v37 }
  0xf6   : > { %v474_v18 = vpop.f32.mrf.mxu0  ;;  %v554_v19 = vpop.f32.mrf.mxu1 }
  0xf7   : > { %594 = vst [vmem:[%s1191_s28 + $0x58] sm:$0xff] %v480_v16  ;;  %610 = vst [vmem:[%s1191_s28 + $0xd8] sm:$0xff] %v560_v17  ;;  %v475_v20 = vadd.f32 %v1187_v37, %v474_v18  ;;  %v555_v21 = vadd.f32 %v1187_v37, %v554_v19 }
  0xf8   : > { %v845_v22 = vpop.f32.mrf.mxu0  ;;  %v869_v23 = vpop.f32.mrf.mxu1 }
  0xf9   : > { %593 = vst [vmem:[%s1191_s28 + $0x50] sm:$0xff] %v475_v20  ;;  %609 = vst [vmem:[%s1191_s28 + $0xd0] sm:$0xff] %v555_v21  ;;  %v490_v24 = vadd.f32 %v845_v22, %v1187_v37  ;;  %v570_v25 = vadd.f32 %v869_v23, %v1187_v37 }
  0xfa   : > { %v484_v26 = vpop.f32.mrf.mxu0  ;;  %v564_v27 = vpop.f32.mrf.mxu1 }
  0xfb   : > { %596 = vst [vmem:[%s1191_s28 + $0x68] sm:$0xff] %v490_v24  ;;  %612 = vst [vmem:[%s1191_s28 + $0xe8] sm:$0xff] %v570_v25  ;;  %v485_v28 = vadd.f32 %v1187_v37, %v484_v26  ;;  %v565_v29 = vadd.f32 %v1187_v37, %v564_v27 }
  0xfc   : > { %v848_v30 = vpop.f32.mrf.mxu0  ;;  %v872_v31 = vpop.f32.mrf.mxu1 }
  0xfd   : > { %595 = vst [vmem:[%s1191_s28 + $0x60] sm:$0xff] %v485_v28  ;;  %611 = vst [vmem:[%s1191_s28 + $0xe0] sm:$0xff] %v565_v29  ;;  %v500_v32 = vadd.f32 %v848_v30, %v1187_v37  ;;  %v580_v33 = vadd.f32 %v872_v31, %v1187_v37 }
  0xfe   : > { %v494_v34 = vpop.f32.mrf.mxu0  ;;  %v574_v35 = vpop.f32.mrf.mxu1 }
  0xff   : > { %598 = vst [vmem:[%s1191_s28 + $0x78] sm:$0xff] %v500_v32  ;;  %614 = vst [vmem:[%s1191_s28 + $0xf8] sm:$0xff] %v580_v33  ;;  %v495_v36 = vadd.f32 %v1187_v37, %v494_v34  ;;  %v575_v38 = vadd.f32 %v1187_v37, %v574_v35 }
 0x101   : > { %597 = vst [vmem:[%s1191_s28 + $0x70] sm:$0xff] %v495_v36  ;;  %613 = vst [vmem:[%s1191_s28 + $0xf0] sm:$0xff] %v575_v38 }
 0x102   : > { %953 = shalt.err (!%p950_p5)
}
 0x103   : > { %s954_s11 = scalar_lea.hbm %s1254_s6, 4096  ;;  %s958_s21 = scalar_lea.hbm %s1314_s3, 8192 }
 0x104   : > { %p955_p6 = scmp.ne.s32.totalorder %s1254_s6, %s954_s11  ;;  %p959_p10 = scmp.lt.s32.totalorder %s1254_s6, %s1314_s3 }
 0x105   : > { %p960_p11 = scmp.lt.s32.totalorder %s958_s21, %s954_s11 }
 0x106   : > { %p956_p7 = pnand %p955_p6, %p1081_p4 }
 0x107   : > { %p961_p12 = por %p960_p11, %p959_p10 }
 0x108   : > { %p957_p9 = pneg %p956_p7 }
 0x10a   : > { %p962_p13 = pnand %p961_p12, %p957_p9 }
 0x10c   : > { %965 = shalt.err (!%p962_p13)
}
 0x10d   : > { %s1019_s27 = smov 128   ;;  %s1020_s28 = smov 8  }
 0x10e   : > { %883 = dma.vmem_to_hbm [thread:$0]  (%p1081_p4), %s1256_s30, 4096, %s1254_s6, %s1266_s15, %s1019_s27, %s1019_s27, %s1020_s28  }
 0x10f PF: > { %p889_p0 = scmp.ge.s32.totalorder %s1016_s17, 2  ;;  %s645_s29 = sand.u32 1, %s996_s12  }
 0x110   : > { %s646_s4 = scalar_lea.sflag [#allocation3], %s645_s29 }
 0x111   : > { %p886_p1 = pnand %p889_p0, %p1088_p8 }
 0x113   : > { %p887_p2 = pneg %p886_p1 }
 0x115   : > { %991 = dma.done.wait (%p887_p2), %s646_s4, 4096  }
 0x116   : > { %993 = vsyncadd (%p887_p2), %s646_s4, 4294963200  ;;  %s16_s17 = sadd.s32 1, %s1016_s17   ;;  %s1317_s12 = smov %s1000_s13 }
 0x117   : > { %p13_p3 = scmp.ge.s32.totalorder %s16_s17, 4   ;;  %s1318_s13 = smov %s1004_s14 }
 0x118   : > { %s1319_s14 = smov %s1094_s25  ;;  %s1320_s15 = smov %s1012_s16 }
 0x119   : > { %s1321_s16 = smov %s1323_s20  ;;  %15 = sbr.rel (!%p13_p3) target bundleno = 4 (0x4), region = 73 }
 0x11e   :  { %651 = vsyncpa [#allocation3], 1 }
 0x11f   :  { %653 = vsyncpa [#allocation3 + $0x1], 1 }

</bundles_post_ra>
